<compile_context>
chip_gen: v5e
topology: v5e:2x2
jax: 0.10.0
libtpu: 0.0.40
codegen_flags: <defaults>
</compile_context>

<pallas_src>
import functools

import jax
import jax.numpy as jnp
from jax.experimental import pallas as pl
from jax.experimental.pallas import tpu as pltpu

_LANES = 128
_SUBLANES = 8


def _outconv_kernel(w_ref, b_ref, x_ref, o_ref):
    """1x1 conv on one (ROWS_TILE, 128) pixel slab via VPU broadcast-FMAs.

    w_ref: SMEM (C_out*C_in,) f32  flattened conv weight, row-major (o, c)
    b_ref: SMEM (C_out,)      f32  bias
    x_ref: VMEM (1, C_in,  ROWS_TILE, 128)   pixels fill sublanes + lanes
    o_ref: VMEM (1, C_out, ROWS_TILE, 128)
    """
    c_in = x_ref.shape[1]
    c_out = o_ref.shape[1]

    # Hoist: each input-channel slab is loaded and cast to f32 exactly once.
    xs = [x_ref[0, c, :, :].astype(jnp.float32) for c in range(c_in)]

    for o in range(c_out):
        acc = xs[0] * w_ref[o * c_in]
        for c in range(1, c_in):
            acc = acc + xs[c] * w_ref[o * c_in + c]
        o_ref[0, o, :, :] = (acc + b_ref[o]).astype(o_ref.dtype)


def _pick_rows_tile(rows, n_batch, c_in, c_out, itemsize, max_rows_tile,
                    vmem_budget_bytes):
    """Pick ROWS_TILE (rows of 128 pixels) per grid step.

    - capped by a double-buffered (in + out) VMEM budget (v7x-safe)
    - multiple of 8 when it does not cover the full row axis (8,128 rule)
    - keeps >= 2 grid steps when possible so the v7x megacore gets work
    """
    bytes_per_row = (c_in + c_out) * _LANES * itemsize * 2  # x2 double-buffer
    cap = max(1, vmem_budget_bytes // bytes_per_row)
    cap = min(cap, max_rows_tile)

    if rows <= cap:
        tile = rows                                   # full dim -> always legal
    else:
        tile = max(_SUBLANES, (cap // _SUBLANES) * _SUBLANES)

    # Ensure the grid has >= 2 steps (v7x has 2 TensorCores) when possible.
    if n_batch * pl.cdiv(rows, tile) < 2 and rows >= 2 * _SUBLANES:
        tile = max(_SUBLANES, ((rows // 2) // _SUBLANES) * _SUBLANES)
    return tile


@functools.partial(jax.jit, static_argnames=("max_rows_tile",))
def outconv_pallas(x_nchw, weight, bias, *, max_rows_tile=512):
    """1x1 conv: forward of nn.Conv2d(in_channels, out_channels, kernel_size=1).

    x_nchw: (N, C_in, H, W); weight: (C_out, C_in, 1, 1); bias: (C_out,).
    Returns (N, C_out, H, W) in x_nchw.dtype.
    """
    n, c_in, h, w = x_nchw.shape
    c_out = weight.shape[0]
    hw = h * w

    # Pixel axis -> (rows, 128): free reshape when HW % 128 == 0; otherwise a
    # single pad of the flat pixel axis (garbage tail is sliced off at the end).
    hw_pad = pl.cdiv(hw, _LANES) * _LANES
    x3 = x_nchw.reshape(n, c_in, hw)
    if hw_pad != hw:
        x3 = jnp.pad(x3, ((0, 0), (0, 0), (0, hw_pad - hw)))
    rows = hw_pad // _LANES
    x4 = x3.reshape(n, c_in, rows, _LANES)

    w_flat = weight.reshape(c_out * c_in).astype(jnp.float32)  # (o, c) row-major
    b_flat = bias.reshape(c_out).astype(jnp.float32)

    itemsize = jnp.dtype(x_nchw.dtype).itemsize
    rows_tile = _pick_rows_tile(rows, n, c_in, c_out, itemsize,
                                max_rows_tile, vmem_budget_bytes=16 << 20)
    grid = (n, pl.cdiv(rows, rows_tile))

    out4 = pl.pallas_call(
        _outconv_kernel,
        out_shape=jax.ShapeDtypeStruct((n, c_out, rows, _LANES), x_nchw.dtype),
        grid_spec=pltpu.PrefetchScalarGridSpec(
            # weight + bias tables land in SMEM once, before the grid runs.
            num_scalar_prefetch=2,
            grid=grid,
            in_specs=[
                pl.BlockSpec((1, c_in, rows_tile, _LANES),
                             lambda i, j, w_r, b_r: (i, 0, j, 0)),
            ],
            out_specs=pl.BlockSpec((1, c_out, rows_tile, _LANES),
                                   lambda i, j, w_r, b_r: (i, 0, j, 0)),
        ),
        compiler_params=pltpu.CompilerParams(
            dimension_semantics=("parallel", "parallel"),
        ),
    )(w_flat, b_flat, x4)

    out3 = out4.reshape(n, c_out, hw_pad)
    if hw_pad != hw:
        out3 = out3[:, :, :hw]
    return out3.reshape(n, c_out, h, w)


def init_outconv_params(key, in_channels, out_channels, dtype=jnp.float32):
    """Deterministic init mimicking nn.Conv2d default (uniform(-b, b), b=1/sqrt(fan_in))."""
    kw, kb = jax.random.split(key)
    fan_in = in_channels * 1 * 1
    bound = 1.0 / jnp.sqrt(fan_in)
    weight = jax.random.uniform(
        kw, (out_channels, in_channels, 1, 1), dtype, minval=-bound, maxval=bound
    )
    bias = jax.random.uniform(kb, (out_channels,), dtype, minval=-bound, maxval=bound)
    return weight, bias


if __name__ == "__main__":
    key = jax.random.PRNGKey(0)
    k_x, k_p = jax.random.split(key)

    N, C_IN, C_OUT, H, W = 2, 4, 3, 16, 16
    x = jax.random.normal(k_x, (N, C_IN, H, W), dtype=jnp.float32)
    weight, bias = init_outconv_params(k_p, C_IN, C_OUT)

    out = outconv_pallas(x, weight, bias)
    out = jax.block_until_ready(out)

    # Reference check against plain JAX (same math as nn.Conv2d kernel_size=1).
    ref = jnp.einsum("nchw,oc->nohw", x, weight[:, :, 0, 0]) + bias[None, :, None, None]
    assert out.shape == (N, C_OUT, H, W)
    assert jnp.allclose(out, ref, atol=1e-5, rtol=1e-5)

    print("KERNEL_OK")
</pallas_src>

<mosaic_0001>
module attributes {stable_mosaic.version = 11 : i64} {
  func.func @_outconv_kernel(%arg0: i32, %arg1: i32, %arg2: memref<12xf32, #tpu.memory_space<smem>>, %arg3: memref<3xf32, #tpu.memory_space<smem>>, %arg4: memref<1x4x2x128xf32, #tpu.memory_space<vmem>>, %arg5: memref<1x3x2x128xf32, #tpu.memory_space<vmem>>) attributes {dimension_semantics = [#tpu.dimension_semantics<parallel>, #tpu.dimension_semantics<parallel>], iteration_bounds = array<i64: 2, 1>, scalar_prefetch = 2 : i64, scratch_operands = 0 : i64, tpu.core_type = #tpu.core_type<tc>, window_params = [{transform_indices = @transform_0, window_bounds = array<i64: 1, 4, 2, 128>}, {transform_indices = @transform_1, window_bounds = array<i64: 1, 3, 2, 128>}]} {
    %c0 = arith.constant 0 : index
    %c0_0 = arith.constant 0 : index
    %c0_1 = arith.constant 0 : index
    %c0_2 = arith.constant 0 : index
    %0 = vector.load %arg4[%c0, %c0_0, %c0_1, %c0_2] : memref<1x4x2x128xf32, #tpu.memory_space<vmem>>, vector<1x1x2x128xf32>
    %1 = vector.shape_cast %0 : vector<1x1x2x128xf32> to vector<2x128xf32>
    %c0_3 = arith.constant 0 : index
    %c1 = arith.constant 1 : index
    %c0_4 = arith.constant 0 : index
    %c0_5 = arith.constant 0 : index
    %2 = vector.load %arg4[%c0_3, %c1, %c0_4, %c0_5] : memref<1x4x2x128xf32, #tpu.memory_space<vmem>>, vector<1x1x2x128xf32>
    %3 = vector.shape_cast %2 : vector<1x1x2x128xf32> to vector<2x128xf32>
    %c0_6 = arith.constant 0 : index
    %c2 = arith.constant 2 : index
    %c0_7 = arith.constant 0 : index
    %c0_8 = arith.constant 0 : index
    %4 = vector.load %arg4[%c0_6, %c2, %c0_7, %c0_8] : memref<1x4x2x128xf32, #tpu.memory_space<vmem>>, vector<1x1x2x128xf32>
    %5 = vector.shape_cast %4 : vector<1x1x2x128xf32> to vector<2x128xf32>
    %c0_9 = arith.constant 0 : index
    %c3 = arith.constant 3 : index
    %c0_10 = arith.constant 0 : index
    %c0_11 = arith.constant 0 : index
    %6 = vector.load %arg4[%c0_9, %c3, %c0_10, %c0_11] : memref<1x4x2x128xf32, #tpu.memory_space<vmem>>, vector<1x1x2x128xf32>
    %7 = vector.shape_cast %6 : vector<1x1x2x128xf32> to vector<2x128xf32>
    %c0_12 = arith.constant 0 : index
    %8 = memref.load %arg2[%c0_12] : memref<12xf32, #tpu.memory_space<smem>>
    %9 = vector.broadcast %8 : f32 to vector<2x128xf32>
    %10 = arith.mulf %1, %9 : vector<2x128xf32>
    %c1_13 = arith.constant 1 : index
    %11 = memref.load %arg2[%c1_13] : memref<12xf32, #tpu.memory_space<smem>>
    %12 = vector.broadcast %11 : f32 to vector<2x128xf32>
    %13 = arith.mulf %3, %12 : vector<2x128xf32>
    %14 = arith.addf %10, %13 : vector<2x128xf32>
    %c2_14 = arith.constant 2 : index
    %15 = memref.load %arg2[%c2_14] : memref<12xf32, #tpu.memory_space<smem>>
    %16 = vector.broadcast %15 : f32 to vector<2x128xf32>
    %17 = arith.mulf %5, %16 : vector<2x128xf32>
    %18 = arith.addf %14, %17 : vector<2x128xf32>
    %c3_15 = arith.constant 3 : index
    %19 = memref.load %arg2[%c3_15] : memref<12xf32, #tpu.memory_space<smem>>
    %20 = vector.broadcast %19 : f32 to vector<2x128xf32>
    %21 = arith.mulf %7, %20 : vector<2x128xf32>
    %22 = arith.addf %18, %21 : vector<2x128xf32>
    %c0_16 = arith.constant 0 : index
    %23 = memref.load %arg3[%c0_16] : memref<3xf32, #tpu.memory_space<smem>>
    %24 = vector.broadcast %23 : f32 to vector<2x128xf32>
    %25 = arith.addf %22, %24 : vector<2x128xf32>
    %c0_17 = arith.constant 0 : index
    %c0_18 = arith.constant 0 : index
    %c0_19 = arith.constant 0 : index
    %c0_20 = arith.constant 0 : index
    %26 = vector.load %arg5[%c0_17, %c0_18, %c0_19, %c0_20] : memref<1x3x2x128xf32, #tpu.memory_space<vmem>>, vector<1x1x2x128xf32>
    %27 = vector.shape_cast %26 : vector<1x1x2x128xf32> to vector<2x128xf32>
    %28 = vector.shape_cast %25 : vector<2x128xf32> to vector<1x1x2x128xf32>
    tpu.vector_store %arg5[%c0_17, %c0_18, %c0_19, %c0_20], %28 {strides = array<i32>} : memref<1x3x2x128xf32, #tpu.memory_space<vmem>>, vector<1x1x2x128xf32>,
    %c4 = arith.constant 4 : index
    %29 = memref.load %arg2[%c4] : memref<12xf32, #tpu.memory_space<smem>>
    %30 = vector.broadcast %29 : f32 to vector<2x128xf32>
    %31 = arith.mulf %1, %30 : vector<2x128xf32>
    %c5 = arith.constant 5 : index
    %32 = memref.load %arg2[%c5] : memref<12xf32, #tpu.memory_space<smem>>
    %33 = vector.broadcast %32 : f32 to vector<2x128xf32>
    %34 = arith.mulf %3, %33 : vector<2x128xf32>
    %35 = arith.addf %31, %34 : vector<2x128xf32>
    %c6 = arith.constant 6 : index
    %36 = memref.load %arg2[%c6] : memref<12xf32, #tpu.memory_space<smem>>
    %37 = vector.broadcast %36 : f32 to vector<2x128xf32>
    %38 = arith.mulf %5, %37 : vector<2x128xf32>
    %39 = arith.addf %35, %38 : vector<2x128xf32>
    %c7 = arith.constant 7 : index
    %40 = memref.load %arg2[%c7] : memref<12xf32, #tpu.memory_space<smem>>
    %41 = vector.broadcast %40 : f32 to vector<2x128xf32>
    %42 = arith.mulf %7, %41 : vector<2x128xf32>
    %43 = arith.addf %39, %42 : vector<2x128xf32>
    %c1_21 = arith.constant 1 : index
    %44 = memref.load %arg3[%c1_21] : memref<3xf32, #tpu.memory_space<smem>>
    %45 = vector.broadcast %44 : f32 to vector<2x128xf32>
    %46 = arith.addf %43, %45 : vector<2x128xf32>
    %c0_22 = arith.constant 0 : index
    %c1_23 = arith.constant 1 : index
    %c0_24 = arith.constant 0 : index
    %c0_25 = arith.constant 0 : index
    %47 = vector.load %arg5[%c0_22, %c1_23, %c0_24, %c0_25] : memref<1x3x2x128xf32, #tpu.memory_space<vmem>>, vector<1x1x2x128xf32>
    %48 = vector.shape_cast %47 : vector<1x1x2x128xf32> to vector<2x128xf32>
    %49 = vector.shape_cast %46 : vector<2x128xf32> to vector<1x1x2x128xf32>
    tpu.vector_store %arg5[%c0_22, %c1_23, %c0_24, %c0_25], %49 {strides = array<i32>} : memref<1x3x2x128xf32, #tpu.memory_space<vmem>>, vector<1x1x2x128xf32>,
    %c8 = arith.constant 8 : index
    %50 = memref.load %arg2[%c8] : memref<12xf32, #tpu.memory_space<smem>>
    %51 = vector.broadcast %50 : f32 to vector<2x128xf32>
    %52 = arith.mulf %1, %51 : vector<2x128xf32>
    %c9 = arith.constant 9 : index
    %53 = memref.load %arg2[%c9] : memref<12xf32, #tpu.memory_space<smem>>
    %54 = vector.broadcast %53 : f32 to vector<2x128xf32>
    %55 = arith.mulf %3, %54 : vector<2x128xf32>
    %56 = arith.addf %52, %55 : vector<2x128xf32>
    %c10 = arith.constant 10 : index
    %57 = memref.load %arg2[%c10] : memref<12xf32, #tpu.memory_space<smem>>
    %58 = vector.broadcast %57 : f32 to vector<2x128xf32>
    %59 = arith.mulf %5, %58 : vector<2x128xf32>
    %60 = arith.addf %56, %59 : vector<2x128xf32>
    %c11 = arith.constant 11 : index
    %61 = memref.load %arg2[%c11] : memref<12xf32, #tpu.memory_space<smem>>
    %62 = vector.broadcast %61 : f32 to vector<2x128xf32>
    %63 = arith.mulf %7, %62 : vector<2x128xf32>
    %64 = arith.addf %60, %63 : vector<2x128xf32>
    %c2_26 = arith.constant 2 : index
    %65 = memref.load %arg3[%c2_26] : memref<3xf32, #tpu.memory_space<smem>>
    %66 = vector.broadcast %65 : f32 to vector<2x128xf32>
    %67 = arith.addf %64, %66 : vector<2x128xf32>
    %c0_27 = arith.constant 0 : index
    %c2_28 = arith.constant 2 : index
    %c0_29 = arith.constant 0 : index
    %c0_30 = arith.constant 0 : index
    %68 = vector.load %arg5[%c0_27, %c2_28, %c0_29, %c0_30] : memref<1x3x2x128xf32, #tpu.memory_space<vmem>>, vector<1x1x2x128xf32>
    %69 = vector.shape_cast %68 : vector<1x1x2x128xf32> to vector<2x128xf32>
    %70 = vector.shape_cast %67 : vector<2x128xf32> to vector<1x1x2x128xf32>
    tpu.vector_store %arg5[%c0_27, %c2_28, %c0_29, %c0_30], %70 {strides = array<i32>} : memref<1x3x2x128xf32, #tpu.memory_space<vmem>>, vector<1x1x2x128xf32>,
    return
  }
  func.func @transform_0(%arg0: i32, %arg1: i32, %arg2: memref<12xf32, #tpu.memory_space<smem>>, %arg3: memref<3xf32, #tpu.memory_space<smem>>) -> (i32, i32, i32, i32) {
    %c0_i32 = arith.constant 0 : i32
    %c0_i32_0 = arith.constant 0 : i32
    %c0_i32_1 = arith.constant 0 : i32
    return %arg0, %c0_i32, %arg1, %c0_i32_0 : i32, i32, i32, i32
  }
  func.func @transform_1(%arg0: i32, %arg1: i32, %arg2: memref<12xf32, #tpu.memory_space<smem>>, %arg3: memref<3xf32, #tpu.memory_space<smem>>) -> (i32, i32, i32, i32) {
    %c0_i32 = arith.constant 0 : i32
    %c0_i32_0 = arith.constant 0 : i32
    %c0_i32_1 = arith.constant 0 : i32
    return %arg0, %c0_i32, %arg1, %c0_i32_0 : i32, i32, i32, i32
  }
}

</mosaic_0001>

<bundles_post_ra>
// kernel: outconv_pallas.1
= control target key start
LH: loop header
LB: loop body
LE: loop exit
PB: predicated region body
PF: predicated region fallthrough
CT: control target
= control target key end

     0   :  { %s418_s18 = smov [#allocation3]   ;;  %s419_s19 = smov [#allocation4]   ;;  %s491_s0 = inlined_call_operand.vmem [shape: f32[12], index: 0, kind: input, shape index: {}]   ;;  %s492_s2 = inlined_call_operand.vmem [shape: f32[2,4,2,128], index: 2, kind: input, shape index: {}]   ;;  %s493_s3 = inlined_call_operand.vmem [shape: f32[2,3,2,128], index: 3, kind: output, shape index: {}]   ;;  %s494_s1 = inlined_call_operand.vmem [shape: f32[3], index: 1, kind: input, shape index: {}]  }
   0x1   :  { %s9_s14 = sshll.u32 %s491_s0, 4  ;;  %s14_s17 = sshll.u32 %s494_s1, 4  ;;  %s10_s14 = int_to_ptr.vmem [resolvable:$true] %s9_s14  ;;  %s15_s17 = int_to_ptr.vmem [resolvable:$true] %s14_s17 }
   0x2   :  { %12 = dma.vmem_to_smem %s10_s14, 16, %s418_s18, [#allocation2] }
   0x3   :  { %17 = dma.vmem_to_smem %s15_s17, 16, %s419_s19, [#allocation2] }
   0x4   :  { %404 = dma.done.wait [#allocation2], 32 }
   0x5   :  { %405 = vsyncadd [#allocation2], 4294967264 }
   0x6   :  { %20 = sfence }
   0x7   :  { %s446_s20 = smov 0   ;;  %s448_s21 = smov 0  }
   0x8   :  { %s450_s22 = smov 0  }
   0x9 LB: > { %s38_s0 = sadd.s32 1, %s412_s21  ;;  %p316_p0 = scmp.ge.s32.totalorder %s416_s22, 1  ;;  %s416_s22 = sphi %s450_s22, %s26_s22   ;;  %s412_s21 = sphi %s448_s21, %s496_s21   ;;  %s408_s20 = sphi %s446_s20, %s495_s20  }
   0xa   : > { %p40_p1 = scmp.ge.s32.totalorder %s38_s0, 2  ;;  %p121_p2 = scmp.lt.s32.totalorder %s416_s22, 3 }
   0xc   : > { %s498_s0 = smov (%p40_p1, %s38_s0), 0  ;;  %p122_p3 = pnand %p316_p0, %p121_p2 }
   0xd   : > { %p147_p4 = scmp.lt.s32.totalorder (!%p122_p3), %s408_s20, 1  ;;  %s170_s1 = sld [smem:[#allocation3]] (!%p122_p3) }
   0xe   : > { %125 = sbr.rel (%p122_p3) target bundleno = 44 (0x2c), region = 24  ;;  %s323_s23 = sld [smem:[#allocation3 + $0x1]] (!%p122_p3) }
   0xf   : > { %s324_s24 = sld [smem:[#allocation3 + $0x2]] (!%p122_p3) }
  0x10   : > { %s325_s29 = sld [smem:[#allocation3 + $0x3]] (!%p122_p3) }
  0x11   : > { %s185_s30 = sld [smem:[#allocation4]] (!%p122_p3) }
  0x12   : > { %s326_s4 = sld [smem:[#allocation3 + $0x4]] (!%p122_p3) }
  0x13   : > { %s500_s20 = smov (!%p147_p4, %s408_s20), 1  ;;  %v171_v2 = vstv %s170_s1  ;;  %s327_s5 = sld [smem:[#allocation3 + $0x5]] }
  0x14   : > { %s340_s25 = sshll.u32 %s500_s20, 3  ;;  %v174_v5 = vstv %s323_s23  ;;  %s328_s6 = sld [smem:[#allocation3 + $0x6]] }
  0x15   : > { %s154_s28 = scalar_lea.vmem %s492_s2, %s340_s25  ;;  %v178_v8 = vstv %s324_s24  ;;  %s341_s7 = smul.u32 6, %s500_s20 }
  0x16   : > { %v163_v0 = vld [vmem:[%s154_s28] sm:$0x3]  ;;  %v320_v1 = vld [vmem:[%s154_s28 + $0x2] sm:$0x3]  ;;  %v321_v3 = vld [vmem:[%s154_s28 + $0x4] sm:$0x3]  ;;  %v182_v11 = vstv %s325_s29 }
  0x17   : > { %v172_v4 = vmul.f32 %v171_v2, %v163_v0  ;;  %v175_v6 = vmul.f32 %v320_v1, %v174_v5  ;;  %v322_v7 = vld [vmem:[%s154_s28 + $0x6] sm:$0x3]  ;;  %v179_v10 = vmul.f32 %v321_v3, %v178_v8  ;;  %s329_s8 = sld [smem:[#allocation3 + $0x7]]  ;;  %v186_v14 = vstv %s185_s30  ;;  %s476_s14 = scalar_lea.vmem %s493_s3, %s341_s7 }
  0x18   : > { %v183_v13 = vmul.f32 %v322_v7, %v182_v11  ;;  %s471_s9 = sld [smem:[#allocation4 + $0x1]]  ;;  %v190_v16 = vstv %s326_s4 }
  0x19   : > { %v176_v9 = vadd.f32 %v175_v6, %v172_v4  ;;  %s332_s10 = sld [smem:[#allocation3 + $0x8]]  ;;  %v191_v17 = vmul.f32 %v190_v16, %v163_v0  ;;  %v193_v18 = vstv %s327_s5 }
  0x1a   : > { %s333_s11 = sld [smem:[#allocation3 + $0x9]]  ;;  %v194_v20 = vmul.f32 %v320_v1, %v193_v18  ;;  %v197_v21 = vstv %s328_s6 }
  0x1b   : > { %v180_v12 = vadd.f32 %v179_v10, %v176_v9  ;;  %s334_s15 = sld [smem:[#allocation3 + $0xa]]  ;;  %v198_v22 = vmul.f32 %v321_v3, %v197_v21 }
  0x1c   : > { %s335_s16 = sld [smem:[#allocation3 + $0xb]]  ;;  %v195_v24 = vadd.f32 %v194_v20, %v191_v17 }
  0x1d   : > { %v184_v15 = vadd.f32 %v183_v13, %v180_v12  ;;  %v201_v23 = vstv %s329_s8  ;;  %s336_s17 = sld [smem:[#allocation4 + $0x2]] }
  0x1e   : > { %v202_v25 = vmul.f32 %v322_v7, %v201_v23  ;;  %v199_v27 = vadd.f32 %v198_v22, %v195_v24  ;;  %v205_v30 = vstv %s471_s9 }
  0x1f   : > { %v187_v19 = vadd.f32 %v186_v14, %v184_v15  ;;  %v210_v26 = vstv %s332_s10 }
  0x20   : > { %v211_v28 = vmul.f32 %v210_v26, %v163_v0  ;;  %v213_v29 = vstv %s333_s11  ;;  %v203_v33 = vadd.f32 %v202_v25, %v199_v27 }
  0x21   : > { %188 = vst [vmem:[%s476_s14] sm:$0x3] %v187_v19  ;;  %v214_v31 = vmul.f32 %v320_v1, %v213_v29  ;;  %v217_v32 = vstv %s334_s15 }
  0x22   : > { %v218_v34 = vmul.f32 %v321_v3, %v217_v32  ;;  %v221_v35 = vstv %s335_s16  ;;  %v206_v38 = vadd.f32 %v205_v30, %v203_v33 }
  0x23   : > { %v215_v36 = vadd.f32 %v214_v31, %v211_v28  ;;  %v222_v37 = vmul.f32 %v322_v7, %v221_v35  ;;  %v225_v40 = vstv %s336_s17 }
  0x24   : > { %331 = vst [vmem:[%s476_s14 + $0x2] sm:$0x3] %v206_v38 }
  0x25   : > { %v219_v39 = vadd.f32 %v218_v34, %v215_v36 }
  0x27   : > { %v223_v41 = vadd.f32 %v222_v37, %v219_v39 }
  0x29   : > { %v226_v42 = vadd.f32 %v225_v40, %v223_v41 }
  0x2b   : > { %337 = vst [vmem:[%s476_s14 + $0x4] sm:$0x3] %v226_v42 }
  0x2c PF: > { %s26_s22 = sadd.s32 1, %s416_s22   ;;  %s495_s20 = smov %s412_s21 }
  0x2d   : > { %p23_p5 = scmp.ge.s32.totalorder %s26_s22, 4   ;;  %s496_s21 = smov %s498_s0 }
  0x2f   :  { %25 = sbr.rel (!%p23_p5) target bundleno = 9 (0x9), region = 59 }

</bundles_post_ra>
